<compile_context>
chip_gen: v6e
topology: v6e:2x2x1
jax: 0.10.0
libtpu: 0.0.40
codegen_flags: <defaults>
</compile_context>

<pallas_src>
import functools
import math

import jax
import jax.numpy as jnp
from jax.experimental import pallas as pl
from jax.experimental.pallas import tpu as pltpu


# --------------------------------------------------------------------------
# Fused encoder-block kernel: one grid step == one batch element (S, E) slab.
# --------------------------------------------------------------------------
def _encoder_block_kernel(
    x_ref,
    ln1_g_ref, ln1_b_ref,
    wq_ref, wk_ref, wv_ref,
    bq_ref, bk_ref, bv_ref,
    wo_ref, bo_ref,
    ln2_g_ref, ln2_b_ref,
    w1_ref, b1_ref, w2_ref, b2_ref,
    o_ref,
    h1_ref,                      # (S, E) f32 VMEM scratch for the attn residual
    *, num_heads, eps, q_tile, m_tile,
):
    x = x_ref[0].astype(jnp.float32)          # (S, E) activation slab
    S, E = x.shape
    Dh = E // num_heads
    scale = 1.0 / math.sqrt(Dh)
    M = w1_ref.shape[1]

    def layer_norm(v, g_ref, b_ref):
        # one-pass mean / E[x^2]
        mean = jnp.mean(v, axis=-1, keepdims=True)
        msq = jnp.mean(v * v, axis=-1, keepdims=True)
        inv = jax.lax.rsqrt(msq - mean * mean + eps)
        return (v - mean) * inv * g_ref[...] + b_ref[...]

    # ---------------- attention branch ----------------
    xn = layer_norm(x, ln1_g_ref, ln1_b_ref).astype(jnp.bfloat16)
    # three lane-dense (S,E) projections; bf16 MXU operands, f32 accumulation
    q = jnp.dot(xn, wq_ref[...], preferred_element_type=jnp.float32) + bq_ref[...]
    k = jnp.dot(xn, wk_ref[...], preferred_element_type=jnp.float32) + bk_ref[...]
    v = jnp.dot(xn, wv_ref[...], preferred_element_type=jnp.float32) + bv_ref[...]
    # fold 1/sqrt(Dh) into q once ((S,E) VPU pass instead of H x (S,S))
    qb = (q * scale).astype(jnp.bfloat16)
    kb = k.astype(jnp.bfloat16)
    vb = v.astype(jnp.bfloat16)
    wo = wo_ref[...]                          # (E, E) bf16
    bo = bo_ref[...]                          # (1, E) f32

    n_q = S // q_tile
    for qi in range(n_q):                     # flash-style query-row tiling
        r0 = qi * q_tile
        acc = jnp.zeros((q_tile, E), jnp.float32)
        for h in range(num_heads):
            c0 = h * Dh
            qh = qb[r0:r0 + q_tile, c0:c0 + Dh]
            kh = kb[:, c0:c0 + Dh]
            vh = vb[:, c0:c0 + Dh]
            s = jax.lax.dot_general(qh, kh, (((1,), (1,)), ((), ())),
                                    preferred_element_type=jnp.float32)   # (tq, S)
            s = s - jnp.max(s, axis=-1, keepdims=True)
            p = jnp.exp(s)
            inv = pl.reciprocal(jnp.sum(p, axis=-1, keepdims=True), approx=True)
            oh = jnp.dot(p.astype(jnp.bfloat16), vh,
                         preferred_element_type=jnp.float32) * inv         # (tq, Dh)
            # accumulate directly into the out-projection: lane-dense (tq, E)
            # MXU output, no per-head concat / (S, Dh) stores.
            acc = acc + jnp.dot(oh.astype(jnp.bfloat16), wo[c0:c0 + Dh, :],
                                preferred_element_type=jnp.float32)
        # fused out-proj bias + residual #1
        h1_ref[r0:r0 + q_tile, :] = x[r0:r0 + q_tile, :] + acc + bo

    # ---------------- MLP branch ----------------
    h1 = h1_ref[...]
    hn = layer_norm(h1, ln2_g_ref, ln2_b_ref).astype(jnp.bfloat16)
    mlp = jnp.zeros((S, E), jnp.float32)
    for mi in range(M // m_tile):             # bound the (S, m_tile) intermediate
        c0 = mi * m_tile
        t = jnp.dot(hn, w1_ref[:, c0:c0 + m_tile],
                    preferred_element_type=jnp.float32) + b1_ref[:, c0:c0 + m_tile]
        # exact erf-based GELU, matching torch.nn.GELU() default
        t = 0.5 * t * (1.0 + jax.lax.erf(t * (1.0 / math.sqrt(2.0))))
        mlp = mlp + jnp.dot(t.astype(jnp.bfloat16), w2_ref[c0:c0 + m_tile, :],
                            preferred_element_type=jnp.float32)

    # TODO(synk): dropout (attention probs + MLP) is identity (inference semantics).
    o_ref[0] = (h1 + mlp + b2_ref[...]).astype(o_ref.dtype)   # fused residual #2


def transformer_encoder_block(x, params, num_heads, eps=1e-5):
    """x: (B, S, E) -> (B, S, E). Single fused pallas_call, grid over batch."""
    B, S, E = x.shape
    M = params["mlp_w1"].shape[1]
    assert E % num_heads == 0
    assert S % 8 == 0, "pad the token axis to a multiple of 8 sublanes"

    q_tile = 128 if (S > 128 and S % 128 == 0) else S
    m_tile = 512 if (M > 512 and M % 512 == 0) else M

    wdt = jnp.bfloat16

    def row(v):  # 1-D params -> (1, N) lane-major f32 rows
        return v.reshape(1, -1).astype(jnp.float32)

    in_w, in_b = params["in_w"], params["in_b"]
    wq, wk, wv = (in_w[:, i * E:(i + 1) * E].astype(wdt) for i in range(3))
    bq, bk, bv = (row(in_b[i * E:(i + 1) * E]) for i in range(3))
    wo, bo = params["out_w"].astype(wdt), row(params["out_b"])
    w1, b1 = params["mlp_w1"].astype(wdt), row(params["mlp_b1"])
    w2, b2 = params["mlp_w2"].astype(wdt), row(params["mlp_b2"])
    ln1_g, ln1_b = row(params["ln1_g"]), row(params["ln1_b"])
    ln2_g, ln2_b = row(params["ln2_g"]), row(params["ln2_b"])

    operands = (x, ln1_g, ln1_b, wq, wk, wv, bq, bk, bv, wo, bo,
                ln2_g, ln2_b, w1, b1, w2, b2)

    act_spec = pl.BlockSpec((1, S, E), lambda b: (b, 0, 0))

    def const_spec(a):  # full-extent weight block, same tile every grid step
        return pl.BlockSpec(a.shape, lambda b: (0,) * a.ndim)

    in_specs = [act_spec] + [const_spec(a) for a in operands[1:]]

    # Cost estimate so XLA schedules surrounding ops around this long call.
    flops = B * (8 * S * E * E + 4 * S * S * E + 4 * S * E * M)
    transcendentals = B * (num_heads * S * S + S * M + 3 * S)
    weight_bytes = sum(int(a.size) * a.dtype.itemsize for a in operands[1:])
    bytes_accessed = 2 * B * S * E * x.dtype.itemsize + weight_bytes

    # VMEM budget derived from resident buffers (pipeliner double-buffers),
    # clamped to stay inside physical VMEM (64 MiB on v7x, 128 MiB v5e/v6e).
    act_bytes = S * E * x.dtype.itemsize
    scratch_bytes = S * E * 4
    work_bytes = 4 * S * max(3 * E, E + m_tile, q_tile + E) * 4
    est = 2 * weight_bytes + 4 * act_bytes + scratch_bytes + work_bytes
    vmem_limit = max(32 * 1024 * 1024, min(2 * est, 100 * 1024 * 1024))
    try:
        cap = pltpu.get_tpu_info().vmem_capacity_bytes
        vmem_limit = min(vmem_limit, int(cap) * 3 // 4)
    except Exception:
        pass

    return pl.pallas_call(
        functools.partial(_encoder_block_kernel, num_heads=num_heads, eps=eps,
                          q_tile=q_tile, m_tile=m_tile),
        out_shape=jax.ShapeDtypeStruct((B, S, E), x.dtype),
        grid=(B,),
        in_specs=in_specs,
        out_specs=act_spec,
        scratch_shapes=[pltpu.VMEM((S, E), jnp.float32)],
        compiler_params=pltpu.CompilerParams(
            dimension_semantics=("parallel",),   # batch shards across TCs on v7x
            vmem_limit_bytes=int(vmem_limit),
        ),
        cost_estimate=pl.CostEstimate(flops=int(flops),
                                      transcendentals=int(transcendentals),
                                      bytes_accessed=int(bytes_accessed)),
    )(*operands)


# --------------------------------------------------------------------------
# Pure-JAX reference (f32, same math) for a correctness cross-check.
# --------------------------------------------------------------------------
def _reference(x, p, num_heads, eps=1e-5):
    def ln(v, g, b):
        mean = jnp.mean(v, axis=-1, keepdims=True)
        var = jnp.mean((v - mean) ** 2, axis=-1, keepdims=True)
        return (v - mean) * jax.lax.rsqrt(var + eps) * g + b

    B, S, E = x.shape
    Dh = E // num_heads
    xn = ln(x, p["ln1_g"], p["ln1_b"])
    qkv = xn @ p["in_w"] + p["in_b"]
    q, k, v = jnp.split(qkv, 3, axis=-1)

    def heads(t):
        return t.reshape(B, S, num_heads, Dh).transpose(0, 2, 1, 3)

    qh, kh, vh = heads(q), heads(k), heads(v)
    s = jnp.einsum("bhqd,bhkd->bhqk", qh, kh) / math.sqrt(Dh)
    pm = jax.nn.softmax(s, axis=-1)
    a = jnp.einsum("bhqk,bhkd->bhqd", pm, vh).transpose(0, 2, 1, 3).reshape(B, S, E)
    a = a @ p["out_w"] + p["out_b"]
    h = x + a
    hn = ln(h, p["ln2_g"], p["ln2_b"])
    m = hn @ p["mlp_w1"] + p["mlp_b1"]
    m = 0.5 * m * (1.0 + jax.lax.erf(m / math.sqrt(2.0)))
    m = m @ p["mlp_w2"] + p["mlp_b2"]
    return h + m


if __name__ == "__main__":
    B, S, E, H, M = 2, 8, 32, 4, 64          # batch=2, seq=8, emb=32, heads=4, mlp=64
    key = jax.random.PRNGKey(0)
    ks = jax.random.split(key, 9)

    def nrm(k, shape, scale=0.05):
        return (scale * jax.random.normal(k, shape)).astype(jnp.float32)

    params = dict(
        ln1_g=jnp.ones((E,), jnp.float32), ln1_b=jnp.zeros((E,), jnp.float32),
        in_w=nrm(ks[0], (E, 3 * E)), in_b=nrm(ks[1], (3 * E,)),
        out_w=nrm(ks[2], (E, E)), out_b=nrm(ks[3], (E,)),
        ln2_g=jnp.ones((E,), jnp.float32), ln2_b=jnp.zeros((E,), jnp.float32),
        mlp_w1=nrm(ks[4], (E, M)), mlp_b1=nrm(ks[5], (M,)),
        mlp_w2=nrm(ks[6], (M, E)), mlp_b2=nrm(ks[7], (E,)),
    )
    x = jax.random.normal(ks[8], (B, S, E), dtype=jnp.float32)

    out = transformer_encoder_block(x, params, num_heads=H)
    jax.block_until_ready(out)
    assert out.shape == (B, S, E)

    ref = _reference(x, params, H)
    assert jnp.allclose(out, ref, atol=2e-2, rtol=2e-2), float(jnp.max(jnp.abs(out - ref)))
    print("KERNEL_OK")
</pallas_src>

<mosaic_0001>
module attributes {stable_mosaic.version = 11 : i64} {
  func.func @_encoder_block_kernel(%arg0: i32, %arg1: memref<1x8x32xf32, #tpu.memory_space<vmem>>, %arg2: memref<1x32xf32, #tpu.memory_space<vmem>>, %arg3: memref<1x32xf32, #tpu.memory_space<vmem>>, %arg4: memref<32x32xbf16, #tpu.memory_space<vmem>>, %arg5: memref<32x32xbf16, #tpu.memory_space<vmem>>, %arg6: memref<32x32xbf16, #tpu.memory_space<vmem>>, %arg7: memref<1x32xf32, #tpu.memory_space<vmem>>, %arg8: memref<1x32xf32, #tpu.memory_space<vmem>>, %arg9: memref<1x32xf32, #tpu.memory_space<vmem>>, %arg10: memref<32x32xbf16, #tpu.memory_space<vmem>>, %arg11: memref<1x32xf32, #tpu.memory_space<vmem>>, %arg12: memref<1x32xf32, #tpu.memory_space<vmem>>, %arg13: memref<1x32xf32, #tpu.memory_space<vmem>>, %arg14: memref<32x64xbf16, #tpu.memory_space<vmem>>, %arg15: memref<1x64xf32, #tpu.memory_space<vmem>>, %arg16: memref<64x32xbf16, #tpu.memory_space<vmem>>, %arg17: memref<1x32xf32, #tpu.memory_space<vmem>>, %arg18: memref<1x8x32xf32, #tpu.memory_space<vmem>>, %arg19: memref<8x32xf32, #tpu.memory_space<vmem>>) attributes {dimension_semantics = [#tpu.dimension_semantics<parallel>], iteration_bounds = array<i64: 2>, scalar_prefetch = 0 : i64, scratch_operands = 1 : i64, tpu.core_type = #tpu.core_type<tc>, window_params = [{transform_indices = @transform_0, window_bounds = array<i64: 1, 8, 32>}, {pipeline_mode = #tpu.pipeline_mode<synchronous>, transform_indices = @transform_1, window_bounds = array<i64: 1, 32>}, {pipeline_mode = #tpu.pipeline_mode<synchronous>, transform_indices = @transform_2, window_bounds = array<i64: 1, 32>}, {pipeline_mode = #tpu.pipeline_mode<synchronous>, transform_indices = @transform_3, window_bounds = array<i64: 32, 32>}, {pipeline_mode = #tpu.pipeline_mode<synchronous>, transform_indices = @transform_4, window_bounds = array<i64: 32, 32>}, {pipeline_mode = #tpu.pipeline_mode<synchronous>, transform_indices = @transform_5, window_bounds = array<i64: 32, 32>}, {pipeline_mode = #tpu.pipeline_mode<synchronous>, transform_indices = @transform_6, window_bounds = array<i64: 1, 32>}, {pipeline_mode = #tpu.pipeline_mode<synchronous>, transform_indices = @transform_7, window_bounds = array<i64: 1, 32>}, {pipeline_mode = #tpu.pipeline_mode<synchronous>, transform_indices = @transform_8, window_bounds = array<i64: 1, 32>}, {pipeline_mode = #tpu.pipeline_mode<synchronous>, transform_indices = @transform_9, window_bounds = array<i64: 32, 32>}, {pipeline_mode = #tpu.pipeline_mode<synchronous>, transform_indices = @transform_10, window_bounds = array<i64: 1, 32>}, {pipeline_mode = #tpu.pipeline_mode<synchronous>, transform_indices = @transform_11, window_bounds = array<i64: 1, 32>}, {pipeline_mode = #tpu.pipeline_mode<synchronous>, transform_indices = @transform_12, window_bounds = array<i64: 1, 32>}, {pipeline_mode = #tpu.pipeline_mode<synchronous>, transform_indices = @transform_13, window_bounds = array<i64: 32, 64>}, {pipeline_mode = #tpu.pipeline_mode<synchronous>, transform_indices = @transform_14, window_bounds = array<i64: 1, 64>}, {pipeline_mode = #tpu.pipeline_mode<synchronous>, transform_indices = @transform_15, window_bounds = array<i64: 64, 32>}, {pipeline_mode = #tpu.pipeline_mode<synchronous>, transform_indices = @transform_16, window_bounds = array<i64: 1, 32>}, {transform_indices = @transform_17, window_bounds = array<i64: 1, 8, 32>}]} {
    %c0 = arith.constant 0 : index
    %c0_0 = arith.constant 0 : index
    %c0_1 = arith.constant 0 : index
    %0 = vector.load %arg1[%c0, %c0_0, %c0_1] : memref<1x8x32xf32, #tpu.memory_space<vmem>>, vector<1x8x32xf32>
    %1 = vector.shape_cast %0 : vector<1x8x32xf32> to vector<8x32xf32>
    %cst = arith.constant dense<0.000000e+00> : vector<8xf32>
    %2 = vector.multi_reduction <add>, %1, %cst [1] : vector<8x32xf32> to vector<8xf32>
    %3 = vector.shape_cast %2 : vector<8xf32> to vector<8x1xf32>
    %cst_2 = arith.constant 3.200000e+01 : f32
    %4 = vector.broadcast %cst_2 : f32 to vector<8x1xf32>
    %5 = arith.divf %3, %4 : vector<8x1xf32>
    %6 = arith.mulf %1, %1 : vector<8x32xf32>
    %cst_3 = arith.constant dense<0.000000e+00> : vector<8xf32>
    %7 = vector.multi_reduction <add>, %6, %cst_3 [1] : vector<8x32xf32> to vector<8xf32>
    %8 = vector.shape_cast %7 : vector<8xf32> to vector<8x1xf32>
    %cst_4 = arith.constant 3.200000e+01 : f32
    %9 = vector.broadcast %cst_4 : f32 to vector<8x1xf32>
    %10 = arith.divf %8, %9 : vector<8x1xf32>
    %11 = arith.mulf %5, %5 : vector<8x1xf32>
    %12 = arith.subf %10, %11 : vector<8x1xf32>
    %cst_5 = arith.constant 9.99999974E-6 : f32
    %13 = vector.broadcast %cst_5 : f32 to vector<8x1xf32>
    %14 = arith.addf %12, %13 : vector<8x1xf32>
    %15 = math.rsqrt %14 : vector<8x1xf32>
    %16 = vector.broadcast %5 : vector<8x1xf32> to vector<8x32xf32>
    %17 = arith.subf %1, %16 : vector<8x32xf32>
    %18 = vector.broadcast %15 : vector<8x1xf32> to vector<8x32xf32>
    %19 = arith.mulf %17, %18 : vector<8x32xf32>
    %c0_6 = arith.constant 0 : index
    %c0_7 = arith.constant 0 : index
    %20 = vector.load %arg2[%c0_6, %c0_7] : memref<1x32xf32, #tpu.memory_space<vmem>>, vector<1x32xf32>
    %21 = vector.broadcast %20 : vector<1x32xf32> to vector<8x32xf32>
    %22 = arith.mulf %19, %21 : vector<8x32xf32>
    %c0_8 = arith.constant 0 : index
    %c0_9 = arith.constant 0 : index
    %23 = vector.load %arg3[%c0_8, %c0_9] : memref<1x32xf32, #tpu.memory_space<vmem>>, vector<1x32xf32>
    %24 = vector.broadcast %23 : vector<1x32xf32> to vector<8x32xf32>
    %25 = arith.addf %22, %24 : vector<8x32xf32>
    %26 = arith.truncf %25 : vector<8x32xf32> to vector<8x32xbf16>
    %c0_10 = arith.constant 0 : index
    %c0_11 = arith.constant 0 : index
    %27 = vector.load %arg4[%c0_10, %c0_11] : memref<32x32xbf16, #tpu.memory_space<vmem>>, vector<32x32xbf16>
    %cst_12 = arith.constant dense<0.000000e+00> : vector<8x32xf32>
    %28 = tpu.matmul %26, %27, %cst_12 {dimension_numbers = #tpu.dot_dimension_numbers<[1], [0], [0], [1], [0, 0, 1, 1], [], []>} : vector<8x32xbf16>, vector<32x32xbf16>, vector<8x32xf32> -> vector<8x32xf32>
    %c0_13 = arith.constant 0 : index
    %c0_14 = arith.constant 0 : index
    %29 = vector.load %arg7[%c0_13, %c0_14] : memref<1x32xf32, #tpu.memory_space<vmem>>, vector<1x32xf32>
    %30 = vector.broadcast %29 : vector<1x32xf32> to vector<8x32xf32>
    %31 = arith.addf %28, %30 : vector<8x32xf32>
    %c0_15 = arith.constant 0 : index
    %c0_16 = arith.constant 0 : index
    %32 = vector.load %arg5[%c0_15, %c0_16] : memref<32x32xbf16, #tpu.memory_space<vmem>>, vector<32x32xbf16>
    %cst_17 = arith.constant dense<0.000000e+00> : vector<8x32xf32>
    %33 = tpu.matmul %26, %32, %cst_17 {dimension_numbers = #tpu.dot_dimension_numbers<[1], [0], [0], [1], [0, 0, 1, 1], [], []>} : vector<8x32xbf16>, vector<32x32xbf16>, vector<8x32xf32> -> vector<8x32xf32>
    %c0_18 = arith.constant 0 : index
    %c0_19 = arith.constant 0 : index
    %34 = vector.load %arg8[%c0_18, %c0_19] : memref<1x32xf32, #tpu.memory_space<vmem>>, vector<1x32xf32>
    %35 = vector.broadcast %34 : vector<1x32xf32> to vector<8x32xf32>
    %36 = arith.addf %33, %35 : vector<8x32xf32>
    %c0_20 = arith.constant 0 : index
    %c0_21 = arith.constant 0 : index
    %37 = vector.load %arg6[%c0_20, %c0_21] : memref<32x32xbf16, #tpu.memory_space<vmem>>, vector<32x32xbf16>
    %cst_22 = arith.constant dense<0.000000e+00> : vector<8x32xf32>
    %38 = tpu.matmul %26, %37, %cst_22 {dimension_numbers = #tpu.dot_dimension_numbers<[1], [0], [0], [1], [0, 0, 1, 1], [], []>} : vector<8x32xbf16>, vector<32x32xbf16>, vector<8x32xf32> -> vector<8x32xf32>
    %c0_23 = arith.constant 0 : index
    %c0_24 = arith.constant 0 : index
    %39 = vector.load %arg9[%c0_23, %c0_24] : memref<1x32xf32, #tpu.memory_space<vmem>>, vector<1x32xf32>
    %40 = vector.broadcast %39 : vector<1x32xf32> to vector<8x32xf32>
    %41 = arith.addf %38, %40 : vector<8x32xf32>
    %cst_25 = arith.constant 0.353553385 : f32
    %42 = vector.broadcast %cst_25 : f32 to vector<8x32xf32>
    %43 = arith.mulf %31, %42 : vector<8x32xf32>
    %44 = arith.truncf %43 : vector<8x32xf32> to vector<8x32xbf16>
    %45 = arith.truncf %36 : vector<8x32xf32> to vector<8x32xbf16>
    %46 = arith.truncf %41 : vector<8x32xf32> to vector<8x32xbf16>
    %c0_26 = arith.constant 0 : index
    %c0_27 = arith.constant 0 : index
    %47 = vector.load %arg10[%c0_26, %c0_27] : memref<32x32xbf16, #tpu.memory_space<vmem>>, vector<32x32xbf16>
    %c0_28 = arith.constant 0 : index
    %c0_29 = arith.constant 0 : index
    %48 = vector.load %arg11[%c0_28, %c0_29] : memref<1x32xf32, #tpu.memory_space<vmem>>, vector<1x32xf32>
    %cst_30 = arith.constant 0.000000e+00 : f32
    %49 = vector.broadcast %cst_30 : f32 to vector<8x32xf32>
    %50 = vector.extract_strided_slice %44 {offsets = [0, 0], sizes = [8, 8], strides = [1, 1]} : vector<8x32xbf16> to vector<8x8xbf16>
    %51 = vector.extract_strided_slice %45 {offsets = [0, 0], sizes = [8, 8], strides = [1, 1]} : vector<8x32xbf16> to vector<8x8xbf16>
    %52 = vector.extract_strided_slice %46 {offsets = [0, 0], sizes = [8, 8], strides = [1, 1]} : vector<8x32xbf16> to vector<8x8xbf16>
    %cst_31 = arith.constant dense<0.000000e+00> : vector<8x8xf32>
    %53 = tpu.matmul %50, %51, %cst_31 {dimension_numbers = #tpu.dot_dimension_numbers<[1], [1], [0], [0], [0, 0, 1, 0], [], []>} : vector<8x8xbf16>, vector<8x8xbf16>, vector<8x8xf32> -> vector<8x8xf32>
    %cst_32 = arith.constant dense<0xFF800000> : vector<8xf32>
    %54 = vector.multi_reduction <maximumf>, %53, %cst_32 [1] : vector<8x8xf32> to vector<8xf32>
    %55 = vector.shape_cast %54 : vector<8xf32> to vector<8x1xf32>
    %56 = vector.broadcast %55 : vector<8x1xf32> to vector<8x8xf32>
    %57 = arith.subf %53, %56 : vector<8x8xf32>
    %58 = math.exp %57 : vector<8x8xf32>
    %cst_33 = arith.constant dense<0.000000e+00> : vector<8xf32>
    %59 = vector.multi_reduction <add>, %58, %cst_33 [1] : vector<8x8xf32> to vector<8xf32>
    %60 = vector.shape_cast %59 : vector<8xf32> to vector<8x1xf32>
    %61 = tpu.reciprocal %60 {approx = true} : vector<8x1xf32> -> vector<8x1xf32>
    %62 = arith.truncf %58 : vector<8x8xf32> to vector<8x8xbf16>
    %cst_34 = arith.constant dense<0.000000e+00> : vector<8x8xf32>
    %63 = tpu.matmul %62, %52, %cst_34 {dimension_numbers = #tpu.dot_dimension_numbers<[1], [0], [0], [1], [0, 0, 1, 1], [], []>} : vector<8x8xbf16>, vector<8x8xbf16>, vector<8x8xf32> -> vector<8x8xf32>
    %64 = vector.broadcast %61 : vector<8x1xf32> to vector<8x8xf32>
    %65 = arith.mulf %63, %64 : vector<8x8xf32>
    %66 = arith.truncf %65 : vector<8x8xf32> to vector<8x8xbf16>
    %67 = vector.extract_strided_slice %47 {offsets = [0, 0], sizes = [8, 32], strides = [1, 1]} : vector<32x32xbf16> to vector<8x32xbf16>
    %cst_35 = arith.constant dense<0.000000e+00> : vector<8x32xf32>
    %68 = tpu.matmul %66, %67, %cst_35 {dimension_numbers = #tpu.dot_dimension_numbers<[1], [0], [0], [1], [0, 0, 1, 1], [], []>} : vector<8x8xbf16>, vector<8x32xbf16>, vector<8x32xf32> -> vector<8x32xf32>
    %69 = arith.addf %49, %68 : vector<8x32xf32>
    %70 = vector.extract_strided_slice %44 {offsets = [0, 8], sizes = [8, 8], strides = [1, 1]} : vector<8x32xbf16> to vector<8x8xbf16>
    %71 = vector.extract_strided_slice %45 {offsets = [0, 8], sizes = [8, 8], strides = [1, 1]} : vector<8x32xbf16> to vector<8x8xbf16>
    %72 = vector.extract_strided_slice %46 {offsets = [0, 8], sizes = [8, 8], strides = [1, 1]} : vector<8x32xbf16> to vector<8x8xbf16>
    %cst_36 = arith.constant dense<0.000000e+00> : vector<8x8xf32>
    %73 = tpu.matmul %70, %71, %cst_36 {dimension_numbers = #tpu.dot_dimension_numbers<[1], [1], [0], [0], [0, 0, 1, 0], [], []>} : vector<8x8xbf16>, vector<8x8xbf16>, vector<8x8xf32> -> vector<8x8xf32>
    %cst_37 = arith.constant dense<0xFF800000> : vector<8xf32>
    %74 = vector.multi_reduction <maximumf>, %73, %cst_37 [1] : vector<8x8xf32> to vector<8xf32>
    %75 = vector.shape_cast %74 : vector<8xf32> to vector<8x1xf32>
    %76 = vector.broadcast %75 : vector<8x1xf32> to vector<8x8xf32>
    %77 = arith.subf %73, %76 : vector<8x8xf32>
    %78 = math.exp %77 : vector<8x8xf32>
    %cst_38 = arith.constant dense<0.000000e+00> : vector<8xf32>
    %79 = vector.multi_reduction <add>, %78, %cst_38 [1] : vector<8x8xf32> to vector<8xf32>
    %80 = vector.shape_cast %79 : vector<8xf32> to vector<8x1xf32>
    %81 = tpu.reciprocal %80 {approx = true} : vector<8x1xf32> -> vector<8x1xf32>
    %82 = arith.truncf %78 : vector<8x8xf32> to vector<8x8xbf16>
    %cst_39 = arith.constant dense<0.000000e+00> : vector<8x8xf32>
    %83 = tpu.matmul %82, %72, %cst_39 {dimension_numbers = #tpu.dot_dimension_numbers<[1], [0], [0], [1], [0, 0, 1, 1], [], []>} : vector<8x8xbf16>, vector<8x8xbf16>, vector<8x8xf32> -> vector<8x8xf32>
    %84 = vector.broadcast %81 : vector<8x1xf32> to vector<8x8xf32>
    %85 = arith.mulf %83, %84 : vector<8x8xf32>
    %86 = arith.truncf %85 : vector<8x8xf32> to vector<8x8xbf16>
    %87 = vector.extract_strided_slice %47 {offsets = [8, 0], sizes = [8, 32], strides = [1, 1]} : vector<32x32xbf16> to vector<8x32xbf16>
    %cst_40 = arith.constant dense<0.000000e+00> : vector<8x32xf32>
    %88 = tpu.matmul %86, %87, %cst_40 {dimension_numbers = #tpu.dot_dimension_numbers<[1], [0], [0], [1], [0, 0, 1, 1], [], []>} : vector<8x8xbf16>, vector<8x32xbf16>, vector<8x32xf32> -> vector<8x32xf32>
    %89 = arith.addf %69, %88 : vector<8x32xf32>
    %90 = vector.extract_strided_slice %44 {offsets = [0, 16], sizes = [8, 8], strides = [1, 1]} : vector<8x32xbf16> to vector<8x8xbf16>
    %91 = vector.extract_strided_slice %45 {offsets = [0, 16], sizes = [8, 8], strides = [1, 1]} : vector<8x32xbf16> to vector<8x8xbf16>
    %92 = vector.extract_strided_slice %46 {offsets = [0, 16], sizes = [8, 8], strides = [1, 1]} : vector<8x32xbf16> to vector<8x8xbf16>
    %cst_41 = arith.constant dense<0.000000e+00> : vector<8x8xf32>
    %93 = tpu.matmul %90, %91, %cst_41 {dimension_numbers = #tpu.dot_dimension_numbers<[1], [1], [0], [0], [0, 0, 1, 0], [], []>} : vector<8x8xbf16>, vector<8x8xbf16>, vector<8x8xf32> -> vector<8x8xf32>
    %cst_42 = arith.constant dense<0xFF800000> : vector<8xf32>
    %94 = vector.multi_reduction <maximumf>, %93, %cst_42 [1] : vector<8x8xf32> to vector<8xf32>
    %95 = vector.shape_cast %94 : vector<8xf32> to vector<8x1xf32>
    %96 = vector.broadcast %95 : vector<8x1xf32> to vector<8x8xf32>
    %97 = arith.subf %93, %96 : vector<8x8xf32>
    %98 = math.exp %97 : vector<8x8xf32>
    %cst_43 = arith.constant dense<0.000000e+00> : vector<8xf32>
    %99 = vector.multi_reduction <add>, %98, %cst_43 [1] : vector<8x8xf32> to vector<8xf32>
    %100 = vector.shape_cast %99 : vector<8xf32> to vector<8x1xf32>
    %101 = tpu.reciprocal %100 {approx = true} : vector<8x1xf32> -> vector<8x1xf32>
    %102 = arith.truncf %98 : vector<8x8xf32> to vector<8x8xbf16>
    %cst_44 = arith.constant dense<0.000000e+00> : vector<8x8xf32>
    %103 = tpu.matmul %102, %92, %cst_44 {dimension_numbers = #tpu.dot_dimension_numbers<[1], [0], [0], [1], [0, 0, 1, 1], [], []>} : vector<8x8xbf16>, vector<8x8xbf16>, vector<8x8xf32> -> vector<8x8xf32>
    %104 = vector.broadcast %101 : vector<8x1xf32> to vector<8x8xf32>
    %105 = arith.mulf %103, %104 : vector<8x8xf32>
    %106 = arith.truncf %105 : vector<8x8xf32> to vector<8x8xbf16>
    %107 = vector.extract_strided_slice %47 {offsets = [16, 0], sizes = [8, 32], strides = [1, 1]} : vector<32x32xbf16> to vector<8x32xbf16>
    %cst_45 = arith.constant dense<0.000000e+00> : vector<8x32xf32>
    %108 = tpu.matmul %106, %107, %cst_45 {dimension_numbers = #tpu.dot_dimension_numbers<[1], [0], [0], [1], [0, 0, 1, 1], [], []>} : vector<8x8xbf16>, vector<8x32xbf16>, vector<8x32xf32> -> vector<8x32xf32>
    %109 = arith.addf %89, %108 : vector<8x32xf32>
    %110 = vector.extract_strided_slice %44 {offsets = [0, 24], sizes = [8, 8], strides = [1, 1]} : vector<8x32xbf16> to vector<8x8xbf16>
    %111 = vector.extract_strided_slice %45 {offsets = [0, 24], sizes = [8, 8], strides = [1, 1]} : vector<8x32xbf16> to vector<8x8xbf16>
    %112 = vector.extract_strided_slice %46 {offsets = [0, 24], sizes = [8, 8], strides = [1, 1]} : vector<8x32xbf16> to vector<8x8xbf16>
    %cst_46 = arith.constant dense<0.000000e+00> : vector<8x8xf32>
    %113 = tpu.matmul %110, %111, %cst_46 {dimension_numbers = #tpu.dot_dimension_numbers<[1], [1], [0], [0], [0, 0, 1, 0], [], []>} : vector<8x8xbf16>, vector<8x8xbf16>, vector<8x8xf32> -> vector<8x8xf32>
    %cst_47 = arith.constant dense<0xFF800000> : vector<8xf32>
    %114 = vector.multi_reduction <maximumf>, %113, %cst_47 [1] : vector<8x8xf32> to vector<8xf32>
    %115 = vector.shape_cast %114 : vector<8xf32> to vector<8x1xf32>
    %116 = vector.broadcast %115 : vector<8x1xf32> to vector<8x8xf32>
    %117 = arith.subf %113, %116 : vector<8x8xf32>
    %118 = math.exp %117 : vector<8x8xf32>
    %cst_48 = arith.constant dense<0.000000e+00> : vector<8xf32>
    %119 = vector.multi_reduction <add>, %118, %cst_48 [1] : vector<8x8xf32> to vector<8xf32>
    %120 = vector.shape_cast %119 : vector<8xf32> to vector<8x1xf32>
    %121 = tpu.reciprocal %120 {approx = true} : vector<8x1xf32> -> vector<8x1xf32>
    %122 = arith.truncf %118 : vector<8x8xf32> to vector<8x8xbf16>
    %cst_49 = arith.constant dense<0.000000e+00> : vector<8x8xf32>
    %123 = tpu.matmul %122, %112, %cst_49 {dimension_numbers = #tpu.dot_dimension_numbers<[1], [0], [0], [1], [0, 0, 1, 1], [], []>} : vector<8x8xbf16>, vector<8x8xbf16>, vector<8x8xf32> -> vector<8x8xf32>
    %124 = vector.broadcast %121 : vector<8x1xf32> to vector<8x8xf32>
    %125 = arith.mulf %123, %124 : vector<8x8xf32>
    %126 = arith.truncf %125 : vector<8x8xf32> to vector<8x8xbf16>
    %127 = vector.extract_strided_slice %47 {offsets = [24, 0], sizes = [8, 32], strides = [1, 1]} : vector<32x32xbf16> to vector<8x32xbf16>
    %cst_50 = arith.constant dense<0.000000e+00> : vector<8x32xf32>
    %128 = tpu.matmul %126, %127, %cst_50 {dimension_numbers = #tpu.dot_dimension_numbers<[1], [0], [0], [1], [0, 0, 1, 1], [], []>} : vector<8x8xbf16>, vector<8x32xbf16>, vector<8x32xf32> -> vector<8x32xf32>
    %129 = arith.addf %109, %128 : vector<8x32xf32>
    %130 = arith.addf %1, %129 : vector<8x32xf32>
    %131 = vector.broadcast %48 : vector<1x32xf32> to vector<8x32xf32>
    %132 = arith.addf %130, %131 : vector<8x32xf32>
    %c0_51 = arith.constant 0 : index
    %c0_52 = arith.constant 0 : index
    %133 = vector.load %arg19[%c0_51, %c0_52] : memref<8x32xf32, #tpu.memory_space<vmem>>, vector<8x32xf32>
    tpu.vector_store %arg19[%c0_51, %c0_52], %132 {strides = array<i32>} : memref<8x32xf32, #tpu.memory_space<vmem>>, vector<8x32xf32>,
    %c0_53 = arith.constant 0 : index
    %c0_54 = arith.constant 0 : index
    %134 = vector.load %arg19[%c0_53, %c0_54] : memref<8x32xf32, #tpu.memory_space<vmem>>, vector<8x32xf32>
    %cst_55 = arith.constant dense<0.000000e+00> : vector<8xf32>
    %135 = vector.multi_reduction <add>, %134, %cst_55 [1] : vector<8x32xf32> to vector<8xf32>
    %136 = vector.shape_cast %135 : vector<8xf32> to vector<8x1xf32>
    %cst_56 = arith.constant 3.200000e+01 : f32
    %137 = vector.broadcast %cst_56 : f32 to vector<8x1xf32>
    %138 = arith.divf %136, %137 : vector<8x1xf32>
    %139 = arith.mulf %134, %134 : vector<8x32xf32>
    %cst_57 = arith.constant dense<0.000000e+00> : vector<8xf32>
    %140 = vector.multi_reduction <add>, %139, %cst_57 [1] : vector<8x32xf32> to vector<8xf32>
    %141 = vector.shape_cast %140 : vector<8xf32> to vector<8x1xf32>
    %cst_58 = arith.constant 3.200000e+01 : f32
    %142 = vector.broadcast %cst_58 : f32 to vector<8x1xf32>
    %143 = arith.divf %141, %142 : vector<8x1xf32>
    %144 = arith.mulf %138, %138 : vector<8x1xf32>
    %145 = arith.subf %143, %144 : vector<8x1xf32>
    %cst_59 = arith.constant 9.99999974E-6 : f32
    %146 = vector.broadcast %cst_59 : f32 to vector<8x1xf32>
    %147 = arith.addf %145, %146 : vector<8x1xf32>
    %148 = math.rsqrt %147 : vector<8x1xf32>
    %149 = vector.broadcast %138 : vector<8x1xf32> to vector<8x32xf32>
    %150 = arith.subf %134, %149 : vector<8x32xf32>
    %151 = vector.broadcast %148 : vector<8x1xf32> to vector<8x32xf32>
    %152 = arith.mulf %150, %151 : vector<8x32xf32>
    %c0_60 = arith.constant 0 : index
    %c0_61 = arith.constant 0 : index
    %153 = vector.load %arg12[%c0_60, %c0_61] : memref<1x32xf32, #tpu.memory_space<vmem>>, vector<1x32xf32>
    %154 = vector.broadcast %153 : vector<1x32xf32> to vector<8x32xf32>
    %155 = arith.mulf %152, %154 : vector<8x32xf32>
    %c0_62 = arith.constant 0 : index
    %c0_63 = arith.constant 0 : index
    %156 = vector.load %arg13[%c0_62, %c0_63] : memref<1x32xf32, #tpu.memory_space<vmem>>, vector<1x32xf32>
    %157 = vector.broadcast %156 : vector<1x32xf32> to vector<8x32xf32>
    %158 = arith.addf %155, %157 : vector<8x32xf32>
    %159 = arith.truncf %158 : vector<8x32xf32> to vector<8x32xbf16>
    %cst_64 = arith.constant 0.000000e+00 : f32
    %160 = vector.broadcast %cst_64 : f32 to vector<8x32xf32>
    %c0_65 = arith.constant 0 : index
    %c0_66 = arith.constant 0 : index
    %161 = vector.load %arg14[%c0_65, %c0_66] : memref<32x64xbf16, #tpu.memory_space<vmem>>, vector<32x64xbf16>
    %cst_67 = arith.constant dense<0.000000e+00> : vector<8x64xf32>
    %162 = tpu.matmul %159, %161, %cst_67 {dimension_numbers = #tpu.dot_dimension_numbers<[1], [0], [0], [1], [0, 0, 1, 1], [], []>} : vector<8x32xbf16>, vector<32x64xbf16>, vector<8x64xf32> -> vector<8x64xf32>
    %c0_68 = arith.constant 0 : index
    %c0_69 = arith.constant 0 : index
    %163 = vector.load %arg15[%c0_68, %c0_69] : memref<1x64xf32, #tpu.memory_space<vmem>>, vector<1x64xf32>
    %164 = vector.broadcast %163 : vector<1x64xf32> to vector<8x64xf32>
    %165 = arith.addf %162, %164 : vector<8x64xf32>
    %cst_70 = arith.constant 5.000000e-01 : f32
    %166 = vector.broadcast %cst_70 : f32 to vector<8x64xf32>
    %167 = arith.mulf %166, %165 : vector<8x64xf32>
    %cst_71 = arith.constant 0.707106769 : f32
    %168 = vector.broadcast %cst_71 : f32 to vector<8x64xf32>
    %169 = arith.mulf %165, %168 : vector<8x64xf32>
    %170 = math.erf %169 : vector<8x64xf32>
    %cst_72 = arith.constant 1.000000e+00 : f32
    %171 = vector.broadcast %cst_72 : f32 to vector<8x64xf32>
    %172 = arith.addf %171, %170 : vector<8x64xf32>
    %173 = arith.mulf %167, %172 : vector<8x64xf32>
    %174 = arith.truncf %173 : vector<8x64xf32> to vector<8x64xbf16>
    %c0_73 = arith.constant 0 : index
    %c0_74 = arith.constant 0 : index
    %175 = vector.load %arg16[%c0_73, %c0_74] : memref<64x32xbf16, #tpu.memory_space<vmem>>, vector<64x32xbf16>
    %cst_75 = arith.constant dense<0.000000e+00> : vector<8x32xf32>
    %176 = tpu.matmul %174, %175, %cst_75 {dimension_numbers = #tpu.dot_dimension_numbers<[1], [0], [0], [1], [0, 0, 1, 1], [], []>} : vector<8x64xbf16>, vector<64x32xbf16>, vector<8x32xf32> -> vector<8x32xf32>
    %177 = arith.addf %160, %176 : vector<8x32xf32>
    %178 = arith.addf %134, %177 : vector<8x32xf32>
    %c0_76 = arith.constant 0 : index
    %c0_77 = arith.constant 0 : index
    %179 = vector.load %arg17[%c0_76, %c0_77] : memref<1x32xf32, #tpu.memory_space<vmem>>, vector<1x32xf32>
    %180 = vector.broadcast %179 : vector<1x32xf32> to vector<8x32xf32>
    %181 = arith.addf %178, %180 : vector<8x32xf32>
    %c0_78 = arith.constant 0 : index
    %c0_79 = arith.constant 0 : index
    %c0_80 = arith.constant 0 : index
    %182 = vector.load %arg18[%c0_78, %c0_79, %c0_80] : memref<1x8x32xf32, #tpu.memory_space<vmem>>, vector<1x8x32xf32>
    %183 = vector.shape_cast %182 : vector<1x8x32xf32> to vector<8x32xf32>
    %184 = vector.shape_cast %181 : vector<8x32xf32> to vector<1x8x32xf32>
    tpu.vector_store %arg18[%c0_78, %c0_79, %c0_80], %184 {strides = array<i32>} : memref<1x8x32xf32, #tpu.memory_space<vmem>>, vector<1x8x32xf32>,
    return
  }
  func.func @transform_0(%arg0: i32) -> (i32, i32, i32) {
    %c0_i32 = arith.constant 0 : i32
    %c0_i32_0 = arith.constant 0 : i32
    %c0_i32_1 = arith.constant 0 : i32
    return %arg0, %c0_i32, %c0_i32_0 : i32, i32, i32
  }
  func.func @transform_1(%arg0: i32) -> (i32, i32) {
    %c0_i32 = arith.constant 0 : i32
    %c0_i32_0 = arith.constant 0 : i32
    %c0_i32_1 = arith.constant 0 : i32
    return %c0_i32, %c0_i32_0 : i32, i32
  }
  func.func @transform_2(%arg0: i32) -> (i32, i32) {
    %c0_i32 = arith.constant 0 : i32
    %c0_i32_0 = arith.constant 0 : i32
    %c0_i32_1 = arith.constant 0 : i32
    return %c0_i32, %c0_i32_0 : i32, i32
  }
  func.func @transform_3(%arg0: i32) -> (i32, i32) {
    %c0_i32 = arith.constant 0 : i32
    %c0_i32_0 = arith.constant 0 : i32
    %c0_i32_1 = arith.constant 0 : i32
    return %c0_i32, %c0_i32_0 : i32, i32
  }
  func.func @transform_4(%arg0: i32) -> (i32, i32) {
    %c0_i32 = arith.constant 0 : i32
    %c0_i32_0 = arith.constant 0 : i32
    %c0_i32_1 = arith.constant 0 : i32
    return %c0_i32, %c0_i32_0 : i32, i32
  }
  func.func @transform_5(%arg0: i32) -> (i32, i32) {
    %c0_i32 = arith.constant 0 : i32
    %c0_i32_0 = arith.constant 0 : i32
    %c0_i32_1 = arith.constant 0 : i32
    return %c0_i32, %c0_i32_0 : i32, i32
  }
  func.func @transform_6(%arg0: i32) -> (i32, i32) {
    %c0_i32 = arith.constant 0 : i32
    %c0_i32_0 = arith.constant 0 : i32
    %c0_i32_1 = arith.constant 0 : i32
    return %c0_i32, %c0_i32_0 : i32, i32
  }
  func.func @transform_7(%arg0: i32) -> (i32, i32) {
    %c0_i32 = arith.constant 0 : i32
    %c0_i32_0 = arith.constant 0 : i32
    %c0_i32_1 = arith.constant 0 : i32
    return %c0_i32, %c0_i32_0 : i32, i32
  }
  func.func @transform_8(%arg0: i32) -> (i32, i32) {
    %c0_i32 = arith.constant 0 : i32
    %c0_i32_0 = arith.constant 0 : i32
    %c0_i32_1 = arith.constant 0 : i32
    return %c0_i32, %c0_i32_0 : i32, i32
  }
  func.func @transform_9(%arg0: i32) -> (i32, i32) {
    %c0_i32 = arith.constant 0 : i32
    %c0_i32_0 = arith.constant 0 : i32
    %c0_i32_1 = arith.constant 0 : i32
    return %c0_i32, %c0_i32_0 : i32, i32
  }
  func.func @transform_10(%arg0: i32) -> (i32, i32) {
    %c0_i32 = arith.constant 0 : i32
    %c0_i32_0 = arith.constant 0 : i32
    %c0_i32_1 = arith.constant 0 : i32
    return %c0_i32, %c0_i32_0 : i32, i32
  }
  func.func @transform_11(%arg0: i32) -> (i32, i32) {
    %c0_i32 = arith.constant 0 : i32
    %c0_i32_0 = arith.constant 0 : i32
    %c0_i32_1 = arith.constant 0 : i32
    return %c0_i32, %c0_i32_0 : i32, i32
  }
  func.func @transform_12(%arg0: i32) -> (i32, i32) {
    %c0_i32 = arith.constant 0 : i32
    %c0_i32_0 = arith.constant 0 : i32
    %c0_i32_1 = arith.constant 0 : i32
    return %c0_i32, %c0_i32_0 : i32, i32
  }
  func.func @transform_13(%arg0: i32) -> (i32, i32) {
    %c0_i32 = arith.constant 0 : i32
    %c0_i32_0 = arith.constant 0 : i32
    %c0_i32_1 = arith.constant 0 : i32
    return %c0_i32, %c0_i32_0 : i32, i32
  }
  func.func @transform_14(%arg0: i32) -> (i32, i32) {
    %c0_i32 = arith.constant 0 : i32
    %c0_i32_0 = arith.constant 0 : i32
    %c0_i32_1 = arith.constant 0 : i32
    return %c0_i32, %c0_i32_0 : i32, i32
  }
  func.func @transform_15(%arg0: i32) -> (i32, i32) {
    %c0_i32 = arith.constant 0 : i32
    %c0_i32_0 = arith.constant 0 : i32
    %c0_i32_1 = arith.constant 0 : i32
    return %c0_i32, %c0_i32_0 : i32, i32
  }
  func.func @transform_16(%arg0: i32) -> (i32, i32) {
    %c0_i32 = arith.constant 0 : i32
    %c0_i32_0 = arith.constant 0 : i32
    %c0_i32_1 = arith.constant 0 : i32
    return %c0_i32, %c0_i32_0 : i32, i32
  }
  func.func @transform_17(%arg0: i32) -> (i32, i32, i32) {
    %c0_i32 = arith.constant 0 : i32
    %c0_i32_0 = arith.constant 0 : i32
    %c0_i32_1 = arith.constant 0 : i32
    return %arg0, %c0_i32, %c0_i32_0 : i32, i32, i32
  }
}

</mosaic_0001>

<bundles_post_ra>
// kernel: tpu_custom_call.1
= control target key start
LH: loop header
LB: loop body
LE: loop exit
PB: predicated region body
PF: predicated region fallthrough
CT: control target
= control target key end

     0   :  { %s2657_s0 = inlined_call_operand.vmem [shape: f32[2,8,32], index: 0, kind: input, shape index: {}]   ;;  %s2658_s1 = inlined_call_operand.vmem [shape: f32[1,32], index: 1, kind: input, shape index: {}]   ;;  %s2659_s2 = inlined_call_operand.vmem [shape: f32[1,32], index: 2, kind: input, shape index: {}]   ;;  %s2660_s3 = inlined_call_operand.vmem [shape: bf16[32,32], index: 3, kind: input, shape index: {}]   ;;  %s2661_s4 = inlined_call_operand.vmem [shape: bf16[32,32], index: 4, kind: input, shape index: {}]   ;;  %s2662_s5 = inlined_call_operand.hbm [shape: bf16[32,32], index: 5, kind: input, shape index: {}]   ;;  %s2663_s6 = inlined_call_operand.vmem [shape: f32[1,32], index: 6, kind: input, shape index: {}]   ;;  %s2664_s7 = inlined_call_operand.vmem [shape: f32[1,32], index: 7, kind: input, shape index: {}]   ;;  %s2665_s8 = inlined_call_operand.vmem [shape: f32[1,32], index: 8, kind: input, shape index: {}]   ;;  %s2666_s9 = inlined_call_operand.hbm [shape: bf16[32,32], index: 9, kind: input, shape index: {}]   ;;  %s2667_s10 = inlined_call_operand.vmem [shape: f32[1,32], index: 10, kind: input, shape index: {}]   ;;  %s2668_s11 = inlined_call_operand.vmem [shape: f32[1,32], index: 11, kind: input, shape index: {}]   ;;  %s2669_s12 = inlined_call_operand.vmem [shape: f32[1,32], index: 12, kind: input, shape index: {}]   ;;  %s2670_s13 = inlined_call_operand.hbm [shape: bf16[32,64], index: 13, kind: input, shape index: {}]   ;;  %s2671_s14 = inlined_call_operand.vmem [shape: f32[1,64], index: 14, kind: input, shape index: {}]   ;;  %s2672_s15 = inlined_call_operand.vmem [shape: bf16[64,32], index: 15, kind: input, shape index: {}]   ;;  %s2673_s16 = inlined_call_operand.vmem [shape: f32[1,32], index: 16, kind: input, shape index: {}]   ;;  %s2674_s17 = inlined_call_operand.hbm [shape: f32[2,8,32], index: 17, kind: output, shape index: {}]  }
   0x1   :  { %2683 = sst [smem:[#allocation19_spill]] %s2657_s0 }
   0x2   :  { %2684 = sst [smem:[#allocation20_spill]] %s2658_s1 }
   0x3   :  { %22 = vsyncpa [#allocation4], 0 }
   0x4   :  { %23 = vsyncpa [#allocation7], 0 }
   0x5   :  { %24 = vsyncpa [#allocation5], 0 }
   0x6   :  { %26 = vsyncpa [#allocation5 + $0x1], 0  ;;  %s2330_s24 = smov 0   ;;  %s2332_s25 = smov 0  }
   0x7   :  { %s2334_s26 = smov 0   ;;  %s2336_s27 = smov 0  }
   0x8 LB: > { %2685 = sst [smem:[#allocation13_spill]] %s2215_s24  ;;  %s2351_s28 = sadd.s32 4294967295, %s2227_s27   ;;  %s2227_s27 = sphi %s2336_s27, %s2706_s27   ;;  %s2223_s26 = sphi %s2334_s26, %s2708_s26   ;;  %s2219_s25 = sphi %s2332_s25, %s2710_s25   ;;  %s2215_s24 = sphi %s2330_s24, %s2709_s24  }
   0x9   : > { %2686 = sst [smem:[#allocation14_spill]] %s2223_s26  ;;  %s1758_s29 = sadd.s32 4294967294, %s2227_s27  }
   0xa   : > { %2687 = sst [smem:[#allocation15_spill]] %s2227_s27  ;;  %s2355_s0 = sadd.s32 1, %s2227_s27  }
   0xb   : > { %2688 = sst [smem:[#allocation16_spill]] %s2355_s0  ;;  %s401_s30 = sadd.s32 1, %s2223_s26 }
   0xc   : > { %s398_s18 = ssub.s32 %s2227_s27, %s2355_s0  ;;  %p411_p0 = scmp.ne.s32.totalorder %s2223_s26, %s2219_s25 }
   0xd   : > { %p399_p1 = scmp.eq.s32.totalorder %s398_s18, 0  ;;  %p412_p2 = scmp.eq.s32.totalorder %s2351_s28, 1 }
   0xe   : > { %p417_p3 = scmp.ne.s32.totalorder %s2219_s25, %s2215_s24  ;;  %p418_p4 = scmp.eq.s32.totalorder %s1758_s29, 1 }
   0xf   : > { %s2366_s19 = scalar_select %p399_p1, %s2223_s26, %s401_s30  }
  0x10   : > { %p2368_p5 = por %p412_p2, %p411_p0  ;;  %p2372_p6 = por %p418_p4, %p417_p3 }
  0x11   : > { %2689 = sst [smem:[#allocation17_spill]] %s2366_s19  ;;  %p1759_p7 = scmp.ge.s32.totalorder %s2227_s27, 1 }
  0x12   : > { %s2690_s1 = scalar_select %p2368_p5, 1, 0 }
  0x13   : > { %s2691_s20 = scalar_select %p2372_p6, 1, 0 }
  0x14   : > { %p425_p8 = scmp.lt.s32.totalorder %s2227_s27, 3  ;;  %p2680_p9 = scmp.eq.s32.totalorder %s2351_s28, 0 }
  0x15   : > { %2692 = sst [smem:[#allocation18_spill]] %s2691_s20  ;;  %s2229_s22 = smov [#allocation6]  }
  0x16   : > { %p2379_p10 = pnand %p1759_p7, %p425_p8  ;;  %s471_s23 = sshll.u32 %s2229_s22, 4  ;;  %s472_s23 = int_to_ptr.vmem [resolvable:$true] %s471_s23 }
  0x17   : > { %s2230_s30 = smov [#allocation3]   ;;  %s2231_s19 = smov [#allocation8]  }
  0x18   : > { %p1984_p11 = pneg %p2379_p10  ;;  %s449_s18 = sshll.u32 %s2230_s30, 4  ;;  %s450_s18 = int_to_ptr.vmem [resolvable:$true] %s449_s18 }
  0x19   : > { %s493_s26 = sshll.u32 %s2231_s19, 4  ;;  %s2092_s0 = scalar_lea.vmem %s472_s23, 256  ;;  %s494_s26 = int_to_ptr.vmem [resolvable:$true] %s493_s26 }
  0x1a   : > { %p2387_p12 = pnand %p2680_p9, %p1984_p11  ;;  %p2093_p0 = scmp.ne.s32.totalorder %s472_s23, %s2092_s0 }
  0x1b   : > { %p2100_p3 = scmp.lt.s32.totalorder %s472_s23, %s472_s23  ;;  %p2101_p4 = scmp.lt.s32.totalorder %s2092_s0, %s2092_s0 }
  0x1c   : > { %p2083_p13 = pneg %p2387_p12 }
  0x1d   : > { %p2102_p7 = por %p2101_p4, %p2100_p3 }
  0x1e   : > { %p2095_p1 = pnand %p2093_p0, %p2083_p13 }
  0x20   : > { %p2096_p2 = pneg %p2095_p1 }
  0x22   : > { %p2103_p8 = pnand %p2102_p7, %p2096_p2 }
  0x24   : > { %2106 = shalt.err (!%p2103_p8)
}
  0x25   : > { %s2232_s22 = smov 64   ;;  %s2233_s30 = smov 4  }
  0x26   : > { %1990 = dma.hbm_to_vmem [thread:$0]  (!%p2387_p12), %s2666_s9, 256, %s472_s23, [#allocation7], %s2232_s22, %s2232_s22, %s2233_s30  }
  0x27   : > { %s2118_s24 = scalar_lea.vmem %s450_s18, 256  ;;  %p2126_p9 = scmp.lt.s32.totalorder %s450_s18, %s450_s18 }
  0x28   : > { %p2119_p11 = scmp.ne.s32.totalorder %s450_s18, %s2118_s24  ;;  %p2127_p6 = scmp.lt.s32.totalorder %s2118_s24, %s2118_s24 }
  0x2a   : > { %p2121_p0 = pnand %p2119_p11, %p2083_p13  ;;  %p2128_p3 = por %p2127_p6, %p2126_p9 }
  0x2c   : > { %p2122_p1 = pneg %p2121_p0 }
  0x2e   : > { %p2129_p2 = pnand %p2128_p3, %p2122_p1 }
  0x30   : > { %2132 = shalt.err (!%p2129_p2)
}
  0x31   : > { %1987 = dma.hbm_to_vmem [thread:$0]  (!%p2387_p12), %s2662_s5, 256, %s450_s18, [#allocation4], %s2232_s22, %s2232_s22, %s2233_s30  }
  0x32   : > { %s2144_s20 = scalar_lea.vmem %s494_s26, 256  ;;  %p2152_p11 = scmp.lt.s32.totalorder %s494_s26, %s494_s26 }
  0x33   : > { %p2145_p4 = scmp.ne.s32.totalorder %s494_s26, %s2144_s20  ;;  %p2153_p0 = scmp.lt.s32.totalorder %s2144_s20, %s2144_s20 }
  0x35   : > { %p2147_p7 = pnand %p2145_p4, %p2083_p13  ;;  %p2154_p5 = por %p2153_p0, %p2152_p11 }
  0x37   : > { %p2148_p8 = pneg %p2147_p7 }
  0x39   : > { %p2155_p6 = pnand %p2154_p5, %p2148_p8 }
  0x3b   : > { %2158 = shalt.err (!%p2155_p6)
}
  0x3c   : > { %1993 = dma.hbm_to_vmem [thread:$0]  (!%p2387_p12), %s2670_s13, 256, %s494_s26, [#allocation7], %s2232_s22, %s2232_s22, %s2233_s30  }
  0x3d   : > { %525 = sbr.rel (%p2379_p10) target bundleno = 2849 (0xb21), region = 88  ;;  %p2695_p9 = scmp.eq.s32.totalorder (!%p2379_p10), %s2351_s28, 0 }
  0x42   : > { %2202 = dma.done.wait (%p2695_p9), [#allocation4], 256   ;;  %p2696_p13 = pmov %p2695_p9 }
  0x43   : > { %p2697_p1 = pmov %p2695_p9 }
  0x44   : > { %2204 = vsyncadd (%p2696_p13), [#allocation4], 4294967040 }
  0x45   : > { %2206 = dma.done.wait (%p2697_p1), [#allocation7], 512   ;;  %p2698_p5 = pmov %p2697_p1 }
  0x46   : > { %p584_p3 = scmp.lt.s32.totalorder %s2351_s28, 1  ;;  %s2699_s18 = sld [smem:[#allocation19_spill]]  ;;  %vm590_vm0 = vcmask 261120   ;;  %v2047_v4 = vld [vmem:[%s2660_s3 + $0x8] sm:$0xff]   ;;  %v2048_v5 = vld [vmem:[#allocation3 + $0x8] sm:$0xff]   ;;  %v2234_v6 = vmov 0.0  }
  0x47   : > { %2208 = vsyncadd (%p2698_p5), [#allocation7], 4294966784  ;;  %1854 = vmatprep.subr.bf16.mxu1 %v2234_v6  ;;  %1870 = vmatprep.subr.bf16.mxu0 %v2234_v6  ;;  %v2049_v7 = vld [vmem:[%s2660_s3] sm:$0xff]   ;;  %v2050_v8 = vld [vmem:[#allocation3] sm:$0xff]   ;;  %vm2235_vm1 = vmmov 0   ;;  %vm886_vm2 = vcmask 1043456  }
  0x48   : > { %s585_s27 = scalar_select %p584_p3, %s2351_s28, 1  ;;  %1855 = vmatpush3.bf16.msra.mxu1 %v2047_v4  ;;  %1871 = vmatpush3.bf16.msra.mxu0 %v2048_v5  ;;  %v1771_v20 = vld [vmem:[%s2659_s2] ss:$0 sm:$0xff]  ;;  %v2051_v23 = vld [vmem:[%s2661_s4 + $0x8] sm:$0xff]   ;;  %vm825_vm3 = vcmask 64512   ;;  %vm1600_vm4 = vcmask 523264  }
  0x49   : > { %1856 = vmatprep.subr.bf16.mxu1 %v2234_v6  ;;  %1872 = vmatprep.subr.bf16.mxu0 %v2234_v6  ;;  %v2052_v25 = vld [vmem:[%s2661_s4] sm:$0xff]   ;;  %s2237_s29 = smov 112   ;;  %s2238_s21 = smov 104  }
  0x4a   : > { %s1769_s26 = sshll.u32 %s585_s27, 3  ;;  %1858 = vmatprep.mubr.msk.bf16.mxu1 %vm2235_vm1, %v2234_v6  ;;  %1874 = vmatprep.mubr.msk.bf16.mxu0 %vm2235_vm1, %v2234_v6  ;;  %s2700_s27 = sld [smem:[#allocation20_spill]]  ;;  %v1780_v26 = vld [vmem:[%s2665_s8] ss:$0 sm:$0xff] }
  0x4b   : > { %v1772_v33 = vld [vmem:[%s2663_s6] ss:$0 sm:$0xff]  ;;  %s581_s0 = sand.u32 1, %s2219_s25   ;;  %p2701_p12 = scmp.ne.s32.totalorder %s2690_s1, 0 }
  0x4c   : > { %s587_s22 = scalar_lea.vmem %s2699_s18, %s1769_s26  ;;  %1857 = vmatpush3.bf16.msra.mxu1 %v2049_v7  ;;  %1873 = vmatpush3.bf16.msra.mxu0 %v2050_v8  ;;  %v1776_v39 = vld [vmem:[%s2664_s7] ss:$0 sm:$0xff]  ;;  %s2236_s26 = smov 120  }
  0x4d   : > { %v2432_v0 = vld [vmem:[%s587_s22] sm:$0xff]  ;;  %1862 = vmatprep.subr.bf16.mxu1 %v2234_v6  ;;  %1884 = vmatprep.subr.bf16.mxu0 %v2234_v6  ;;  %s1768_s20 = sshll.u32 %s581_s0, 3  ;;  %s2239_s19 = smov [#allocation9]  }
  0x4e   : > { %v591_v1 = vsel %vm590_vm0, %v2432_v0, 0.0  ;;  %v596_v2 = vmul.f32 %v2432_v0, %v2432_v0 }
  0x4f   : > { %592 = vadd.xlane.f32.xlu0 %v591_v1 }
  0x50   : > { %v597_v3 = vsel %vm590_vm0, %v596_v2, 0.0  ;;  %v1770_v18 = vld [vmem:[%s2700_s27] ss:$0 sm:$0xff]  ;;  %s1810_s27 = sshll.u32 %s2351_s28, 7  ;;  %s1655_s28 = scalar_lea.sflag [#allocation5], %s581_s0 }
  0x51   : > { %s2615_s22 = scalar_lea.hbm %s2674_s17, %s1810_s27 }
  0x53   : > { %598 = vadd.xlane.f32.xlu0 %v597_v3 }
  0xd8   : > { %v593_v9 = vpop.xlane.xlu0 %592 }
  0xd9   : > { %v595_v10 = vmul.f32 0.03125, %v593_v9 }
  0xdb   : > { %v601_v12 = vmul.f32 %v595_v10, %v595_v10  ;;  %v605_v16 = vsub.f32 %v2432_v0, %v595_v10 }
  0xdc   : > { %v599_v11 = vpop.xlane.xlu0 %598 }
  0xdd   : > { %v600_v13 = vmul.f32 0.03125, %v599_v11 }
  0xdf   : > { %v602_v14 = vsub.f32 %v600_v13, %v601_v12 }
  0xe1   : > { %v603_v15 = vadd.f32 1e-05, %v602_v14 }
  0xe3   : > { %2059 = vrsqrt.f32 %v603_v15  ;;  %v820_v15 = vld [vmem:[#allocation6] sm:$0xf] }
  0xf0   : > { %v2060_v17 = vpop.eup %2059 }
  0xf1   : > { %v606_v19 = vmul.f32 %v2060_v17, %v605_v16  ;;  %v1096_v16 = vsel %vm886_vm2, %v820_v15, 0  ;;  %v821_v17 = vld [vmem:[#allocation6 + $0x4] sm:$0xf] }
  0xf3   : > { %v614_v21 = vmul.f32 %v1770_v18, %v606_v19  ;;  %v1050_v18 = vsel %vm886_vm2, %v821_v17, 0 }
  0xf5   : > { %v622_v22 = vadd.f32 %v1771_v20, %v614_v21 }
  0xf7   : > { %v623_v24 = vpack.c.bf16 %v622_v22, %v622_v22 }
  0xf9   : > { %1859 = vmatmul.mubr.msk.bf16.vlgmr.msra.gmra.mxu1 %vm590_vm0, %v623_v24  ;;  %1875 = vmatmul.mubr.msk.bf16.vlgmr.msra.gmra.mxu0 %vm590_vm0, %v623_v24 }
  0xfa   : > { %1863 = vmatpush3.bf16.msra.mxu1 %v2051_v23  ;;  %1866 = vmatprep.mubr.msk.bf16.mxu1 %vm2235_vm1, %v2234_v6 }
  0xfb   : > { %1864 = vmatprep.subr.bf16.mxu1 %v2234_v6  ;;  %1886 = vmatprep.mubr.msk.bf16.mxu0 %vm2235_vm1, %v2234_v6 }
  0xfe   : > { %1865 = vmatpush3.bf16.msra.mxu1 %v2052_v25 }
  0xff   : > { %1878 = vmatprep.subr.bf16.mxu1 %v2234_v6 }
 0x101   : > { %1867 = vmatmul.mubr.msk.bf16.vlgmr.msra.gmra.mxu1 %vm590_vm0, %v623_v24 }
 0x102   : > { %1880 = vmatprep.mubr.msk.bf16.mxu1 %vm2235_vm1, %v2234_v6 }
 0x1b9   : > { %v684_v27 = vpop.f32.mrf.mxu1  ;;  %v810_v28 = vpop.f32.mrf.mxu0 }
 0x1ba   : > { %v811_v29 = vadd.f32 %v1780_v26, %v810_v28  ;;  %v685_v40 = vadd.f32 %v1772_v33, %v684_v27 }
 0x1bb   : > { %v1860_v30 = vpop.f32.mrf.mxu1  ;;  %v1876_v31 = vpop.f32.mrf.mxu0 }
 0x1bc   : > { %v2482_v32 = vpack.c.bf16 %v811_v29, %v811_v29  ;;  %v816_v44 = vmul.f32 0.35355338, %v685_v40 }
 0x1bd   : > { %v687_v34 = vpop.f32.mrf.mxu1  ;;  %v813_v35 = vpop.f32.mrf.mxu0 }
 0x1be   : > { %v888_v36 = vsel %vm886_vm2, %v2482_v32, 0  ;;  %v817_v49 = vpack.c.bf16 %v816_v44, %v816_v44 }
 0x1bf   : > { %v1861_v37 = vpop.f32.mrf.mxu1  ;;  %v1877_v38 = vpop.f32.mrf.mxu0  ;;  %1885 = vmatpush3.bf16.msra.mxu0 %v888_v36 }
 0x1c0   : > { %1896 = vmatprep.subr.bf16.mxu0 %v2234_v6 }
 0x1c1   : > { %v747_v41 = vpop.f32.mrf.mxu1 }
 0x1c2   : > { %v748_v42 = vadd.f32 %v1776_v39, %v747_v41 }
 0x1c3   : > { %v1868_v43 = vpop.f32.mrf.mxu1 }
 0x1c4   : > { %v2493_v45 = vpack.c.bf16 %v748_v42, %v748_v42 }
 0x1c5   : > { %v750_v46 = vpop.f32.mrf.mxu1 }
 0x1c6   : > { %936 = vrot.lane.b32.xlu1 %v2493_v45, %s2236_s26  ;;  %v830_v47 = vsel %vm825_vm3, %v2493_v45, 0 }
 0x1c7   : > { %v1869_v48 = vpop.f32.mrf.mxu1  ;;  %1879 = vmatpush3.bf16.xpose.msra.mxu1 %v830_v47 }
 0x1c8   : > { %1890 = vmatprep.subr.bf16.mxu1 %v2234_v6 }
 0x1ca   : > { %933 = vrot.lane.b32.xlu1 %v817_v49, %s2236_s26 }
 0x1ce   : > { %1881 = vmatmul.mubr.msk.bf16.vlgmr.msra.gmra.mxu1 %vm825_vm3, %v817_v49 }
 0x1cf   : > { %1892 = vmatprep.mubr.msk.bf16.mxu1 %vm2235_vm1, %v2234_v6 }
 0x238   : > { %v937_v50 = vpop.permute.xlu1 %936 }
 0x239   : > { %v942_v51 = vsel %vm825_vm3, %v937_v50, 0 }
 0x23a   : > { %1891 = vmatpush3.bf16.xpose.msra.mxu1 %v942_v51 }
 0x23b   : > { %1902 = vmatprep.subr.bf16.mxu1 %v2234_v6 }
 0x23c   : > { %v934_v52 = vpop.permute.xlu1 %933 }
 0x241   : > { %1893 = vmatmul.mubr.msk.bf16.vlgmr.msra.gmra.mxu1 %vm825_vm3, %v934_v52 }
 0x242   : > { %1904 = vmatprep.mubr.msk.bf16.mxu1 %vm2235_vm1, %v2234_v6  ;;  %1903 = vmatpush3.bf16.msra.mxu1 %v1050_v18 }
 0x243   : > { %1914 = vmatprep.subr.bf16.mxu1 %v2234_v6 }
 0x28e   : > { %v866_v53 = vpop.f32.mrf.mxu1 }
 0x28f   : > { %v872_v54 = vsel %vm825_vm3, %v866_v53, -inf }
 0x290   : > { %873 = vmax.xlane.f32.xlu0 %v872_v54  ;;  %v1882_v55 = vpop.f32.mrf.mxu1 }
 0x292   : > { %v869_v56 = vpop.f32.mrf.mxu1 }
 0x294   : > { %v1883_v57 = vpop.f32.mrf.mxu1 }
 0x2a6   : > { %996 = vrot.lane.b32.xlu0 %v2482_v32, %s2236_s26  ;;  %s583_s26 = scalar_lea.vmem [#allocation9], %s1768_s20  ;;  %s2163_s20 = sshll.u32 %s2239_s19, 4  ;;  %s2164_s20 = int_to_ptr.vmem [resolvable:$false] %s2163_s20 }
 0x2a7   : > { %s2165_s24 = scalar_lea.vmem %s2164_s20, 256 }
 0x301   : > { %v978_v58 = vpop.f32.mrf.mxu1 }
 0x302   : > { %v984_v59 = vsel %vm825_vm3, %v978_v58, -inf }
 0x303   : > { %985 = vmax.xlane.f32.xlu1 %v984_v59  ;;  %v1894_v60 = vpop.f32.mrf.mxu1 }
 0x305   : > { %v981_v61 = vpop.f32.mrf.mxu1 }
 0x307   : > { %v1895_v62 = vpop.f32.mrf.mxu1 }
 0x314   : > { %1140 = vrot.lane.b32.xlu1 %v2493_v45, %s2237_s29 }
 0x318   : > { %1138 = vrot.lane.b32.xlu1 %v817_v49, %s2237_s29 }
 0x319   : > { %v874_v63 = vpop.xlane.xlu0 %873 }
 0x31a   : > { %v875_v1 = vsub.f32 %v866_v53, %v874_v63 }
 0x31c   : > { %v876_v2 = vmul.f32 1.442695, %v875_v1  ;;  %v822_v1 = vld [vmem:[#allocation6 + $0x8] sm:$0xf] }
 0x31d   : > { %v997_v4 = vpop.permute.xlu0 %996 }
 0x31e   : > { %2061 = vpow2.f32 %v876_v2  ;;  %v1002_v7 = vsel %vm886_vm2, %v997_v4, 0  ;;  %v1253_v2 = vsel %vm886_vm2, %v822_v1, 0  ;;  %v1798_v1 = vld [vmem:[%s2669_s12] ss:$0 sm:$0xff] }
 0x32b   : > { %v2062_v3 = vpop.eup %2061 }
 0x32c   : > { %v882_v5 = vpack.c.bf16 %v2062_v3, %v2062_v3  ;;  %v878_v14 = vsel %vm825_vm3, %v2062_v3, 0.0 }
 0x32e   : > { %1887 = vmatmul.mubr.msk.bf16.vlgmr.msra.gmra.mxu0 %vm825_vm3, %v882_v5 }
 0x32f   : > { %1897 = vmatpush3.bf16.msra.mxu0 %v1002_v7  ;;  %1898 = vmatprep.mubr.msk.bf16.mxu0 %vm2235_vm1, %v2234_v6 }
 0x330   : > { %1908 = vmatprep.subr.bf16.mxu0 %v2234_v6 }
 0x38c   : > { %v986_v8 = vpop.xlane.xlu1 %985 }
 0x38d   : > { %v987_v9 = vsub.f32 %v978_v58, %v986_v8 }
 0x38f   : > { %v988_v10 = vmul.f32 1.442695, %v987_v9 }
 0x390   : > { %v1141_v34 = vpop.permute.xlu1 %1140 }
 0x391   : > { %2063 = vpow2.f32 %v988_v10  ;;  %v1146_v38 = vsel %vm825_vm3, %v1141_v34, 0 }
 0x394   : > { %v1139_v40 = vpop.permute.xlu1 %1138 }
 0x39e   : > { %v2064_v11 = vpop.eup %2063 }
 0x39f   : > { %v990_v12 = vsel %vm825_vm3, %v2064_v11, 0.0  ;;  %v994_v13 = vpack.c.bf16 %v2064_v11, %v2064_v11 }
 0x3a0   : > { %991 = vadd.xlane.f32.xlu0 %v990_v12 }
 0x3a1   : > { %1899 = vmatmul.mubr.msk.bf16.vlgmr.msra.gmra.mxu0 %vm825_vm3, %v994_v13 }
 0x3a2   : > { %1910 = vmatprep.mubr.msk.bf16.mxu0 %vm2235_vm1, %v2234_v6  ;;  %1909 = vmatpush3.bf16.msra.mxu0 %v1096_v16 }
 0x3a3   : > { %1920 = vmatprep.subr.bf16.mxu0 %v2234_v6 }
 0x3a4   : > { %879 = vadd.xlane.f32.xlu0 %v878_v14 }
 0x3ba   : > { %1199 = vrot.lane.b32.xlu0 %v2482_v32, %s2237_s29  ;;  %s1668_s29 = sshll.u32 %s583_s26, 4  ;;  %s2617_s29 = int_to_ptr.vmem [resolvable:$true] %s1668_s29 }
 0x3bb   : > { %s2159_s30 = scalar_lea.vmem %s2617_s29, 128  ;;  %p2166_p7 = scmp.lt.s32.totalorder %s2617_s29, %s2164_s20 }
 0x3bc   : > { %p2160_p10 = scmp.ne.s32.totalorder %s2617_s29, %s2159_s30  ;;  %p2167_p8 = scmp.lt.s32.totalorder %s2165_s24, %s2159_s30 }
 0x3be   : > { %1298 = vrot.lane.b32.xlu0 %v2493_v45, %s2238_s21  ;;  %p2161_p2 = pnand %p2160_p10, %p2701_p12  ;;  %p2168_p11 = por %p2167_p8, %p2166_p7 }
 0x3c0   : > { %p2162_p4 = pneg %p2161_p2 }
 0x3c2   : > { %1296 = vrot.lane.b32.xlu0 %v817_v49, %s2238_s21  ;;  %p2169_p0 = pnand %p2168_p11, %p2162_p4 }
 0x3ee   : > { %v924_v19 = vpop.f32.mrf.mxu0 }
 0x3f0   : > { %v1888_v20 = vpop.f32.mrf.mxu0 }
 0x3f2   : > { %v927_v21 = vpop.f32.mrf.mxu0 }
 0x3f4   : > { %v1889_v22 = vpop.f32.mrf.mxu0 }
 0x429   : > { %v992_v23 = vpop.xlane.xlu0 %991 }
 0x42d   : > { %v880_v24 = vpop.xlane.xlu0 %879 }
 0x42e   : > { %2065 = vrcp.f32 %v880_v24 }
 0x42f   : > { %2067 = vrcp.f32 %v992_v23 }
 0x431   : > { %v1200_v27 = vpop.permute.xlu0 %1199 }
 0x432   : > { %v1205_v29 = vsel %vm886_vm2, %v1200_v27, 0 }
 0x435   : > { %v1299_v59 = vpop.permute.xlu0 %1298 }
 0x436   : > { %v1304_v62 = vsel %vm825_vm3, %v1299_v59, 0 }
 0x439   : > { %v1297_v63 = vpop.permute.xlu0 %1296 }
 0x43b   : > { %v2066_v25 = vpop.eup %2065 }
 0x43c   : > { %v930_v26 = vmul.f32 %v2066_v25, %v924_v19  ;;  %v2068_v30 = vpop.eup %2067 }
 0x43e   : > { %v931_v28 = vpack.c.bf16 %v930_v26, %v930_v26 }
 0x440   : > { %1911 = vmatmul.mubr.msk.bf16.vlgmr.msra.gmra.mxu0 %vm825_vm3, %v931_v28 }
 0x441   : > { %1921 = vmatpush3.bf16.msra.mxu0 %v1205_v29  ;;  %1922 = vmatprep.mubr.msk.bf16.mxu0 %vm2235_vm1, %v2234_v6 }
 0x442   : > { %1932 = vmatprep.subr.bf16.mxu0 %v2234_v6 }
 0x461   : > { %v1038_v31 = vpop.f32.mrf.mxu0 }
 0x462   : > { %v1044_v33 = vmul.f32 %v2068_v30, %v1038_v31 }
 0x463   : > { %v1900_v35 = vpop.f32.mrf.mxu0 }
 0x464   : > { %v1045_v36 = vpack.c.bf16 %v1044_v33, %v1044_v33 }
 0x465   : > { %v1041_v37 = vpop.f32.mrf.mxu0 }
 0x466   : > { %1905 = vmatmul.mubr.msk.bf16.vlgmr.msra.gmra.mxu1 %vm825_vm3, %v1045_v36 }
 0x467   : > { %1915 = vmatpush3.bf16.xpose.msra.mxu1 %v1146_v38  ;;  %v1901_v39 = vpop.f32.mrf.mxu0  ;;  %1916 = vmatprep.mubr.msk.bf16.mxu1 %vm2235_vm1, %v2234_v6 }
 0x468   : > { %1926 = vmatprep.subr.bf16.mxu1 %v2234_v6 }
 0x46e   : > { %1917 = vmatmul.mubr.msk.bf16.vlgmr.msra.gmra.mxu1 %vm825_vm3, %v1139_v40 }
 0x46f   : > { %1928 = vmatprep.mubr.msk.bf16.mxu1 %vm2235_vm1, %v2234_v6  ;;  %1927 = vmatpush3.bf16.msra.mxu1 %v1253_v2 }
 0x470   : > { %1938 = vmatprep.subr.bf16.mxu1 %v2234_v6 }
 0x500   : > { %v1132_v41 = vpop.f32.mrf.mxu0 }
 0x502   : > { %v1912_v42 = vpop.f32.mrf.mxu0 }
 0x503   : > { %v1796_v42 = vld [vmem:[%s2667_s10] ss:$0 sm:$0xff] }
 0x504   : > { %v1135_v43 = vpop.f32.mrf.mxu0 }
 0x506   : > { %v1913_v44 = vpop.f32.mrf.mxu0 }
 0x526   : > { %v1086_v45 = vpop.f32.mrf.mxu1 }
 0x527   : > { %v2542_v46 = vadd.f32 %v1132_v41, %v1086_v45 }
 0x528   : > { %v1906_v47 = vpop.f32.mrf.mxu1 }
 0x52a   : > { %v1089_v48 = vpop.f32.mrf.mxu1 }
 0x52c   : > { %v1907_v49 = vpop.f32.mrf.mxu1 }
 0x52e   : > { %v1182_v50 = vpop.f32.mrf.mxu1 }
 0x52f   : > { %v1188_v51 = vsel %vm825_vm3, %v1182_v50, -inf }
 0x530   : > { %1189 = vmax.xlane.f32.xlu1 %v1188_v51  ;;  %v1918_v52 = vpop.f32.mrf.mxu1 }
 0x531   : > { %v2053_v52 = vld [vmem:[#allocation8 + $0x8] sm:$0xff]  }
 0x532   : > { %v1185_v53 = vpop.f32.mrf.mxu1 }
 0x533   : > { %v2054_v53 = vld [vmem:[#allocation8] sm:$0xff]  }
 0x534   : > { %v1919_v54 = vpop.f32.mrf.mxu1 }
 0x5b9   : > { %v1190_v55 = vpop.xlane.xlu1 %1189 }
 0x5ba   : > { %v1191_v56 = vsub.f32 %v1182_v50, %v1190_v55 }
 0x5bc   : > { %v1192_v57 = vmul.f32 1.442695, %v1191_v56 }
 0x5be   : > { %2069 = vpow2.f32 %v1192_v57 }
 0x5cb   : > { %v2070_v58 = vpop.eup %2069 }
 0x5cc   : > { %v1194_v60 = vsel %vm825_vm3, %v2070_v58, 0.0  ;;  %v1198_v61 = vpack.c.bf16 %v2070_v58, %v2070_v58 }
 0x5cd   : > { %1195 = vadd.xlane.f32.xlu0 %v1194_v60 }
 0x5ce   : > { %1923 = vmatmul.mubr.msk.bf16.vlgmr.msra.gmra.mxu0 %vm825_vm3, %v1198_v61 }
 0x5cf   : > { %1933 = vmatpush3.bf16.xpose.msra.mxu0 %v1304_v62  ;;  %1934 = vmatprep.mubr.msk.bf16.mxu0 %vm2235_vm1, %v2234_v6  ;;  %v1797_v62 = vld [vmem:[%s2668_s11] ss:$0 sm:$0xff] }
 0x5d0   : > { %1944 = vmatprep.subr.bf16.mxu0 %v2234_v6 }
 0x5d6   : > { %1935 = vmatmul.mubr.msk.bf16.vlgmr.msra.gmra.mxu0 %vm825_vm3, %v1297_v63 }
 0x5d7   : > { %1946 = vmatprep.mubr.msk.bf16.mxu0 %vm2235_vm1, %v2234_v6 }
 0x656   : > { %v1196_v3 = vpop.xlane.xlu0 %1195 }
 0x657   : > { %2071 = vrcp.f32 %v1196_v3 }
 0x664   : > { %v2072_v4 = vpop.eup %2071 }
 0x68e   : > { %v1241_v5 = vpop.f32.mrf.mxu0 }
 0x68f   : > { %v1247_v7 = vmul.f32 %v2072_v4, %v1241_v5  ;;  %v2055_v5 = vld [vmem:[%s2672_s15 + $0x18] sm:$0xff]  }
 0x690   : > { %v1924_v8 = vpop.f32.mrf.mxu0 }
 0x691   : > { %v1248_v9 = vpack.c.bf16 %v1247_v7, %v1247_v7  ;;  %v2056_v7 = vld [vmem:[%s2672_s15 + $0x10] sm:$0xff]   ;;  %v2057_v8 = vld [vmem:[%s2672_s15 + $0x8] sm:$0xff]  }
 0x692   : > { %v1244_v10 = vpop.f32.mrf.mxu0 }
 0x693   : > { %1929 = vmatmul.mubr.msk.bf16.vlgmr.msra.gmra.mxu1 %vm825_vm3, %v1248_v9  ;;  %v2058_v9 = vld [vmem:[%s2672_s15] sm:$0xff]  }
 0x694   : > { %v1925_v11 = vpop.f32.mrf.mxu0  ;;  %1940 = vmatprep.mubr.msk.bf16.mxu1 %vm2235_vm1, %v2234_v6  ;;  %v1799_v10 = vld [vmem:[%s2671_s14] ss:$0 sm:$0xff] }
 0x696   : > { %v1340_v12 = vpop.f32.mrf.mxu0 }
 0x697   : > { %v1346_v13 = vsel %vm825_vm3, %v1340_v12, -inf }
 0x698   : > { %1347 = vmax.xlane.f32.xlu1 %v1346_v13  ;;  %v1936_v14 = vpop.f32.mrf.mxu0 }
 0x69a   : > { %v1343_v15 = vpop.f32.mrf.mxu0 }
 0x69c   : > { %v1937_v16 = vpop.f32.mrf.mxu0 }
 0x6a9   : > { %1357 = vrot.lane.b32.xlu1 %v2482_v32, %s2238_s21  ;;  %v823_v32 = vld [vmem:[#allocation6 + $0xc] sm:$0xf] }
 0x6aa   : > { %v1411_v25 = vsel %vm886_vm2, %v823_v32, 0 }
 0x6ab   : > { %1945 = vmatpush3.bf16.msra.mxu0 %v1411_v25 }
 0x6ac   : > { %1958 = vmatprep.subr.bf16.mxu0 %v2234_v6 }
 0x721   : > { %v1348_v17 = vpop.xlane.xlu1 %1347 }
 0x722   : > { %v1349_v18 = vsub.f32 %v1340_v12, %v1348_v17 }
 0x724   : > { %v1350_v19 = vmul.f32 1.442695, %v1349_v18 }
 0x725   : > { %v1358_v20 = vpop.permute.xlu1 %1357 }
 0x726   : > { %2073 = vpow2.f32 %v1350_v19  ;;  %v1363_v21 = vsel %vm886_vm2, %v1358_v20, 0 }
 0x727   : > { %1939 = vmatpush3.bf16.msra.mxu1 %v1363_v21 }
 0x728   : > { %1950 = vmatprep.subr.bf16.mxu1 %v2234_v6 }
 0x733   : > { %v2074_v22 = vpop.eup %2073 }
 0x734   : > { %v1352_v23 = vsel %vm825_vm3, %v2074_v22, 0.0  ;;  %v1356_v24 = vpack.c.bf16 %v2074_v22, %v2074_v22  ;;  %v1808_v22 = vld [vmem:[%s2673_s16] ss:$0 sm:$0xff] }
 0x735   : > { %1353 = vadd.xlane.f32.xlu1 %v1352_v23 }
 0x736   : > { %1941 = vmatmul.mubr.msk.bf16.vlgmr.msra.gmra.mxu1 %vm825_vm3, %v1356_v24 }
 0x737   : > { %1954 = vmatprep.mubr.msk.bf16.mxu1 %vm2235_vm1, %v2234_v6  ;;  %1951 = vmatpush3.bf16.msra.mxu1 %v2053_v52 }
 0x738   : > { %1952 = vmatprep.subr.bf16.mxu1 %v2234_v6 }
 0x73b   : > { %1953 = vmatpush3.bf16.msra.mxu1 %v2054_v53 }
 0x753   : > { %v1289_v26 = vpop.f32.mrf.mxu1 }
 0x754   : > { %v1295_v27 = vadd.f32 %v1289_v26, %v2542_v46 }
 0x755   : > { %v1930_v28 = vpop.f32.mrf.mxu1 }
 0x757   : > { %v1292_v29 = vpop.f32.mrf.mxu1 }
 0x759   : > { %v1931_v30 = vpop.f32.mrf.mxu1 }
 0x7be   : > { %v1354_v31 = vpop.xlane.xlu1 %1353 }
 0x7bf   : > { %2075 = vrcp.f32 %v1354_v31 }
 0x7cc   : > { %v2076_v33 = vpop.eup %2075 }
 0x7f6   : > { %v1399_v34 = vpop.f32.mrf.mxu1 }
 0x7f7   : > { %v1405_v35 = vmul.f32 %v2076_v33, %v1399_v34 }
 0x7f8   : > { %v1942_v36 = vpop.f32.mrf.mxu1 }
 0x7f9   : > { %v1406_v37 = vpack.c.bf16 %v1405_v35, %v1405_v35 }
 0x7fa   : > { %v1402_v38 = vpop.f32.mrf.mxu1 }
 0x7fb   : > { %1947 = vmatmul.mubr.msk.bf16.vlgmr.msra.gmra.mxu0 %vm825_vm3, %v1406_v37 }
 0x7fc   : > { %v1943_v39 = vpop.f32.mrf.mxu1  ;;  %1966 = vmatprep.mubr.msk.bf16.mxu0 %vm2235_vm1, %v2234_v6  ;;  %1959 = vmatpush3.bf16.msra.mxu0 %v2055_v5 }
 0x7fd   : > { %1960 = vmatprep.subr.bf16.mxu0 %v2234_v6 }
 0x800   : > { %1961 = vmatpush3.bf16.msra.mxu0 %v2056_v7 }
 0x801   : > { %1962 = vmatprep.subr.bf16.mxu0 %v2234_v6 }
 0x804   : > { %1963 = vmatpush3.bf16.msra.mxu0 %v2057_v8 }
 0x805   : > { %1964 = vmatprep.subr.bf16.mxu0 %v2234_v6 }
 0x808   : > { %1965 = vmatpush3.bf16.msra.mxu0 %v2058_v9 }
 0x8bb   : > { %v1447_v40 = vpop.f32.mrf.mxu0 }
 0x8bc   : > { %v1453_v41 = vadd.f32 %v1447_v40, %v1295_v27 }
 0x8bd   : > { %v1948_v43 = vpop.f32.mrf.mxu0 }
 0x8be   : > { %v1454_v44 = vadd.f32 %v1453_v41, %v2432_v0 }
 0x8bf   : > { %v1450_v45 = vpop.f32.mrf.mxu0 }
 0x8c0   : > { %v1461_v46 = vadd.f32 %v1796_v42, %v1454_v44 }
 0x8c1   : > { %v1949_v47 = vpop.f32.mrf.mxu0 }
 0x8c2   : > { %1462 = vst.msk [vmem:[#allocation2] sm:$0xff] %vm590_vm0, %v1461_v46 }
 0x8c9   : > { %v1463_v48 = vld [vmem:[#allocation2] sm:$0xff] }
 0x8ca   : > { %v1464_v49 = vsel %vm590_vm0, %v1463_v48, 0.0  ;;  %v1468_v50 = vmul.f32 %v1463_v48, %v1463_v48 }
 0x8cb   : > { %1465 = vadd.xlane.f32.xlu0 %v1464_v49 }
 0x8cc   : > { %v1469_v51 = vsel %vm590_vm0, %v1468_v50, 0.0 }
 0x8cf   : > { %1470 = vadd.xlane.f32.xlu0 %v1469_v51 }
 0x954   : > { %v1466_v0 = vpop.xlane.xlu0 %1465 }
 0x955   : > { %v1467_v54 = vmul.f32 0.03125, %v1466_v0 }
 0x957   : > { %v1473_v56 = vmul.f32 %v1467_v54, %v1467_v54  ;;  %v1477_v60 = vsub.f32 %v1463_v48, %v1467_v54 }
 0x958   : > { %v1471_v55 = vpop.xlane.xlu0 %1470 }
 0x959   : > { %v1472_v57 = vmul.f32 0.03125, %v1471_v55 }
 0x95b   : > { %v1474_v58 = vsub.f32 %v1472_v57, %v1473_v56 }
 0x95d   : > { %v1475_v59 = vadd.f32 1e-05, %v1474_v58 }
 0x95f   : > { %2077 = vrsqrt.f32 %v1475_v59 }
 0x96c   : > { %v2078_v61 = vpop.eup %2077 }
 0x96d   : > { %v1478_v63 = vmul.f32 %v2078_v61, %v1477_v60 }
 0x96f   : > { %v1486_v2 = vmul.f32 %v1797_v62, %v1478_v63 }
 0x971   : > { %v1494_v3 = vadd.f32 %v1798_v1, %v1486_v2 }
 0x973   : > { %v1495_v4 = vpack.c.bf16 %v1494_v3, %v1494_v3 }
 0x975   : > { %1955 = vmatmul.mubr.msk.bf16.vlgmr.msra.gmra.mxu1 %vm590_vm0, %v1495_v4 }
 0xa35   : > { %v1556_v11 = vpop.f32.mrf.mxu1 }
 0xa36   : > { %v1557_v12 = vadd.f32 %v1799_v10, %v1556_v11 }
 0xa37   : > { %v1956_v13 = vpop.f32.mrf.mxu1 }
 0xa38   : > { %v1563_v14 = vmul.f32 0.70710677, %v1557_v12  ;;  %v1562_v6 = vmul.f32 0.5, %v1557_v12 }
 0xa39   : > { %v1559_v15 = vpop.f32.mrf.mxu1 }
 0xa3a   : > { %2079 = verf.f32 %v1563_v14 }
 0xa3b   : > { %v1957_v16 = vpop.f32.mrf.mxu1 }
 0xa47   : > { %v2080_v17 = vpop.eup %2079 }
 0xa48   : > { %v1565_v18 = vadd.f32 1.0, %v2080_v17 }
 0xa4a   : > { %v1566_v19 = vmul.f32 %v1565_v18, %v1562_v6 }
 0xa4c   : > { %v1567_v20 = vpack.c.bf16 %v1566_v19, %v1566_v19 }
 0xa4e   : > { %1967 = vmatmul.mubr.msk.bf16.vlgmr.msra.gmra.mxu0 %vm1600_vm4, %v1567_v20 }
 0xb0e   : > { %v1638_v21 = vpop.f32.mrf.mxu0 }
 0xb0f   : > { %v1644_v23 = vadd.f32 %v1638_v21, %v1463_v48 }
 0xb10   : > { %v1968_v24 = vpop.f32.mrf.mxu0 }
 0xb11   : > { %v1652_v32 = vadd.f32 %v1808_v22, %v1644_v23 }
 0xb12   : > { %v1641_v25 = vpop.f32.mrf.mxu0 }
 0xb13   : > { %1653 = vst.msk [vmem:[%s583_s26] sm:$0xff] %vm590_vm0, %v1652_v32 }
 0xb14   : > { %v1969_v26 = vpop.f32.mrf.mxu0 }
 0xb15   : > { %2172 = shalt.err (!%p2169_p0)
}
 0xb16   : > { %s2173_s23 = scalar_lea.hbm %s2615_s22, 128  ;;  %s2177_s26 = scalar_lea.hbm %s2674_s17, 256 }
 0xb17   : > { %p2174_p6 = scmp.ne.s32.totalorder %s2615_s22, %s2173_s23  ;;  %p2178_p1 = scmp.lt.s32.totalorder %s2615_s22, %s2674_s17 }
 0xb18   : > { %p2179_p5 = scmp.lt.s32.totalorder %s2177_s26, %s2173_s23 }
 0xb19   : > { %p2175_p9 = pnand %p2174_p6, %p2701_p12 }
 0xb1a   : > { %p2180_p3 = por %p2179_p5, %p2178_p1 }
 0xb1b   : > { %p2176_p13 = pneg %p2175_p9 }
 0xb1d   : > { %p2181_p10 = pnand %p2180_p3, %p2176_p13 }
 0xb1f   : > { %2184 = shalt.err (!%p2181_p10)
}
 0xb20   : > { %1982 = dma.vmem_to_hbm [thread:$0]  (%p2701_p12), %s2617_s29, 128, %s2615_s22, %s1655_s28  }
 0xb21 PF: > { %s2702_s30 = sld [smem:[#allocation15_spill]] }
 0xb22   : > { %s2703_s19 = sld [smem:[#allocation13_spill]] }
 0xb23   : > { %s2704_s20 = sld [smem:[#allocation18_spill]] }
 0xb27   : > { %p2004_p2 = scmp.ge.s32.totalorder %s2702_s30, 2 }
 0xb28   : > { %s1680_s24 = sand.u32 1, %s2703_s19  }
 0xb29   : > { %p2705_p4 = scmp.ne.s32.totalorder %s2704_s20, 0  ;;  %s1681_s0 = scalar_lea.sflag [#allocation5], %s1680_s24 }
 0xb2b   : > { %p1995_p7 = pnand %p2004_p2, %p2705_p4 }
 0xb2d   : > { %p1996_p8 = pneg %p1995_p7 }
 0xb2f   : > { %2210 = dma.done.wait (%p1996_p8), %s1681_s0, 128  }
 0xb30   : > { %2212 = vsyncadd (%p1996_p8), %s1681_s0, 4294967168  ;;  %s2706_s27 = sld [smem:[#allocation16_spill]]  ;;  %s2709_s24 = smov %s2219_s25 }
 0xb31   : > { %s2707_s23 = sld [smem:[#allocation14_spill]] }
 0xb32   : > { %s2708_s26 = sld [smem:[#allocation17_spill]] }
 0xb36   : > { %p29_p11 = scmp.ge.s32.totalorder %s2706_s27, 4  }
 0xb37   : > { %s2710_s25 = smov %s2707_s23 }
 0xb38   :  { %31 = sbr.rel (!%p29_p11) target bundleno = 8 (0x8), region = 136 }
 0xb3d   :  { %1686 = vsyncpa [#allocation4], 1 }
 0xb3e   :  { %1688 = vsyncpa [#allocation4 + $0x1], 1 }
 0xb3f   :  { %1689 = vsyncpa [#allocation7], 1 }
 0xb40   :  { %1690 = vsyncpa [#allocation5], 1 }
 0xb41   :  { %1692 = vsyncpa [#allocation5 + $0x1], 1 }

</bundles_post_ra>
